<compile_context>
chip_gen: v7x
topology: tpu7x:2x2x1
jax: 0.10.0
libtpu: 0.0.40
codegen_flags: <defaults>
</compile_context>

<pallas_src>
import functools
import math

import jax
import jax.numpy as jnp
from jax import lax
from jax.experimental import pallas as pl
from jax.experimental.pallas import tpu as pltpu


def _cov_kernel(x_ref, cov_ref, sum_ref, *, cov_dtype):
    """Accumulate per-batch X @ X^T and sum(X) over the K-tile grid axis."""
    t = pl.program_id(1)

    @pl.when(t == 0)
    def _():
        cov_ref[...] = jnp.zeros_like(cov_ref)
        sum_ref[...] = jnp.zeros_like(sum_ref)

    x = x_ref[0]                                   # (C, TK) tile, native dtype
    xm = x if cov_dtype is None else x.astype(cov_dtype)
    # X @ X^T without transposing the tile: contract axis 1 of both operands.
    cov_ref[0] += lax.dot_general(
        xm, xm, (((1,), (1,)), ((), ())), preferred_element_type=jnp.float32)
    # Cross-lane reduce; MXU / DMA are the binding slots for this pass, so the
    # VPU cast + XLU reduce are free filler (max-not-sum) — no ones-column trick.
    sum_ref[0] += jnp.sum(x.astype(jnp.float32), axis=1, keepdims=True)


def _project_kernel(v_ref, x_ref, out_ref):
    x = x_ref[0]                                   # (C, TK2)
    v = v_ref[...].astype(x.dtype)                 # (1, C)
    out_ref[0] = lax.dot_general(
        v, x, (((1,), (0,)), ((), ())), preferred_element_type=jnp.float32)


def _physical_vmem_bytes():
    try:
        info = pltpu.get_tpu_info()
        phys = getattr(info, "vmem_capacity_bytes", None)
        if phys:
            return int(phys)
    except Exception:
        pass
    return 64 << 20  # conservative fallback = v7x per-TC VMEM


def _round_up(x, m):
    return ((x + m - 1) // m) * m


def _largest_pow2_tile(max_cols):
    tk = 128
    while tk * 2 <= max_cols:
        tk *= 2
    return tk


def _plan_tiles(hw, c, itemsize, budget, max_tile_cols=None):
    """Pick (tk1, tk2, hw_padded).

    tk1 (covariance pass) and tk2 (projection pass) are lane-dense multiples of
    128 sized against the VMEM budget (double-buffered input tiles + resident
    accumulators).  tk1 | tk2 | hw_padded always holds, so a single padded array
    serves both passes.
    """
    fixed1 = 2 * c * c * 4 + 2 * c * 4 + (1 << 20)   # resident cov + sum + slack
    fixed2 = c * 4 + (1 << 20)                        # v + slack
    max1 = max(128, ((budget - fixed1) // max(1, 2 * c * itemsize)) // 128 * 128)
    max2 = max(128, ((budget - fixed2) // max(1, 2 * c * itemsize + 8)) // 128 * 128)
    max2 = max(max1, max2)
    if max_tile_cols is not None:
        cap = max(128, (max_tile_cols // 128) * 128)
        max1, max2 = min(max1, cap), min(max2, cap)
        max2 = max(max1, max2)

    hwp0 = _round_up(hw, 128)
    if hwp0 <= max1:                 # whole (padded) row fits: no K tiling at all
        return hwp0, hwp0, hwp0
    tk1 = _largest_pow2_tile(max1)
    tk2 = max(tk1, _largest_pow2_tile(max2))
    return tk1, tk2, _round_up(hw, tk2)


def pca_project(features, mode='projection', *, cov_dtype=None,
                max_tile_cols=None, power_iter_threshold=512, power_iters=64):
    """JAX/Pallas re-implementation of PCAProjectNet.forward (features: NCHW)."""
    N, C, H, W = features.shape
    HW = H * W
    K = N * HW
    itemsize = jnp.dtype(features.dtype).itemsize

    budget = int(_physical_vmem_bytes() * 0.75)   # headroom for compiler scratch
    tk1, tk2, HWP = _plan_tiles(HW, C, itemsize, budget, max_tile_cols)

    x = features.reshape(N, C, HW)                # free reshape, no transpose copy
    if HWP != HW:
        # Zero columns add nothing to X @ X^T or sum(X); k stays N*H*W → exact.
        x = jnp.pad(x, ((0, 0), (0, 0), (0, HWP - HW)))

    cost1 = pl.CostEstimate(
        flops=2 * C * C * N * HWP + 2 * C * N * HWP,
        transcendentals=0,
        bytes_accessed=N * C * HWP * itemsize + N * C * C * 4 + N * C * 4)

    covs, sums = pl.pallas_call(
        functools.partial(_cov_kernel, cov_dtype=cov_dtype),
        grid=(N, HWP // tk1),
        in_specs=[pl.BlockSpec((1, C, tk1), lambda n, t: (n, 0, t))],
        out_specs=(pl.BlockSpec((1, C, C), lambda n, t: (n, 0, 0)),
                   pl.BlockSpec((1, C, 1), lambda n, t: (n, 0, 0))),
        out_shape=(jax.ShapeDtypeStruct((N, C, C), jnp.float32),
                   jax.ShapeDtypeStruct((N, C, 1), jnp.float32)),
        compiler_params=pltpu.CompilerParams(
            dimension_semantics=("parallel", "arbitrary"),
            vmem_limit_bytes=budget),
        cost_estimate=cost1,
    )(x)

    # Tiny (N, C, C) epilogue in plain JAX: cross-batch reduce + one-pass
    # cov = XX^T/K - mean mean^T (no centering pass over the features).
    # TODO(synk): the one-pass form loses precision when |mean| >> std (e.g.
    # post-ReLU features); switch to a shifted/two-pass variant if that bites.
    mean = jnp.sum(sums, axis=0) / K                       # (C, 1)
    cov = jnp.sum(covs, axis=0) / K - mean @ mean.T        # (C, C)

    # Dominant eigenvector.
    # TODO(synk): torch.eig (LAPACK geev) has no Pallas equivalent; the PCA
    # intent is the dominant eigenvector of the symmetric covariance.
    if C >= power_iter_threshold:
        # eigh is O(C^3) and poorly parallelized; only the top eigenvector is
        # needed, so a few CxC matvec power-iteration steps suffice.
        def _body(_, v):
            w = cov @ v
            return w * lax.rsqrt(jnp.sum(w * w) + 1e-30)
        v0 = jnp.full((C, 1), 1.0 / math.sqrt(C), dtype=jnp.float32)
        first_compo = lax.fori_loop(0, power_iters, _body, v0)[:, 0]
    else:
        _, eigvec = jnp.linalg.eigh(cov)
        first_compo = eigvec[:, -1]       # eigh sorts ascending → last = largest

    if mode == 'extra_compo':
        return first_compo

    cost2 = pl.CostEstimate(
        flops=2 * C * N * HWP,
        transcendentals=0,
        bytes_accessed=N * C * HWP * itemsize + N * HWP * 4 + C * 4)

    raw = pl.pallas_call(
        _project_kernel,
        grid=(N, HWP // tk2),
        in_specs=[pl.BlockSpec((1, C), lambda n, t: (0, 0)),
                  pl.BlockSpec((1, C, tk2), lambda n, t: (n, 0, t))],
        out_specs=pl.BlockSpec((1, 1, tk2), lambda n, t: (n, 0, t)),
        out_shape=jax.ShapeDtypeStruct((N, 1, HWP), jnp.float32),
        compiler_params=pltpu.CompilerParams(
            dimension_semantics=("parallel", "parallel"),
            vmem_limit_bytes=budget),
        cost_estimate=cost2,
    )(first_compo.reshape(1, C).astype(jnp.float32), x)

    # Centering correction (scalar v . mean) + guarded global sign fix-up on the
    # tiny (N, H, W) output, done in plain JAX.
    proj = raw[:, 0, :HW].reshape(N, H, W) - jnp.dot(first_compo, mean[:, 0])
    sumv = proj.max() + proj.min()
    s = jnp.where(sumv == 0, jnp.float32(1.0), jnp.sign(sumv))
    return proj * s


def _reference(features):
    """Pure-JAX reference with the same eigenvector/sign convention."""
    N, C, H, W = features.shape
    K = N * H * W
    x = jnp.transpose(features, (1, 0, 2, 3)).reshape(C, K).astype(jnp.float32)
    mean = jnp.sum(x, axis=1, keepdims=True) / K
    xc = x - mean
    cov = xc @ xc.T / K
    _, eigvec = jnp.linalg.eigh(cov)
    v = eigvec[:, -1]
    proj = (v[None, :] @ xc).reshape(N, H, W)
    sumv = proj.max() + proj.min()
    s = jnp.where(sumv == 0, 1.0, jnp.sign(sumv))
    return proj * s


if __name__ == "__main__":
    key = jax.random.PRNGKey(0)
    features = jax.random.normal(key, (2, 4, 16, 16), dtype=jnp.float32)
    ref = jax.block_until_ready(_reference(features))

    # Default (VMEM-budget-sized) tiling: single K tile per batch row here.
    out = jax.block_until_ready(pca_project(features, mode='projection'))
    assert out.shape == (2, 16, 16), out.shape
    assert jnp.allclose(out, ref, atol=1e-3, rtol=1e-3), "mismatch (default tiling)"

    # max_tile_cols=128 → TK=128, 2 K tiles per image: exercises the in-kernel
    # accumulation over the K axis plus the cross-batch reduce in JAX.
    out_small = jax.block_until_ready(
        pca_project(features, mode='projection', max_tile_cols=128))
    assert jnp.allclose(out_small, ref, atol=1e-3, rtol=1e-3), "mismatch (tk=128)"

    compo = jax.block_until_ready(pca_project(features, mode='extra_compo'))
    assert compo.shape == (4,), compo.shape

    # Non-128-multiple spatial size: exercises the zero-padding path (HW=100→128).
    feats_odd = jax.random.normal(jax.random.PRNGKey(1), (2, 4, 10, 10),
                                  dtype=jnp.float32)
    out_odd = jax.block_until_ready(pca_project(feats_odd, mode='projection'))
    ref_odd = jax.block_until_ready(_reference(feats_odd))
    assert jnp.allclose(out_odd, ref_odd, atol=1e-3, rtol=1e-3), "mismatch (padded)"

    print("KERNEL_OK")
</pallas_src>

<mosaic_0001>
module attributes {stable_mosaic.version = 11 : i64} {
  func.func @_cov_kernel(%arg0: i32, %arg1: i32, %arg2: memref<1x4x256xf32, #tpu.memory_space<vmem>>, %arg3: memref<1x4x4xf32, #tpu.memory_space<vmem>>, %arg4: memref<1x4x1xf32, #tpu.memory_space<vmem>>) attributes {dimension_semantics = [#tpu.dimension_semantics<parallel>, #tpu.dimension_semantics<arbitrary>], iteration_bounds = array<i64: 2, 1>, scalar_prefetch = 0 : i64, scratch_operands = 0 : i64, tpu.core_type = #tpu.core_type<tc>, window_params = [{transform_indices = @transform_0, window_bounds = array<i64: 1, 4, 256>}, {transform_indices = @transform_1, window_bounds = array<i64: 1, 4, 4>}, {transform_indices = @transform_2, window_bounds = array<i64: 1, 4, 1>}]} {
    %c0_i32 = arith.constant 0 : i32
    %0 = arith.cmpi eq, %arg1, %c0_i32 : i32
    %1 = arith.extui %0 : i1 to i32
    %c0_i32_0 = arith.constant 0 : i32
    %2 = arith.cmpi ne, %1, %c0_i32_0 : i32
    scf.if %2 {
      %cst_16 = arith.constant 0.000000e+00 : f32
      %20 = vector.broadcast %cst_16 : f32 to vector<1x4x4xf32>
      %c0_17 = arith.constant 0 : index
      %c0_18 = arith.constant 0 : index
      %c0_19 = arith.constant 0 : index
      %21 = vector.load %arg3[%c0_17, %c0_18, %c0_19] : memref<1x4x4xf32, #tpu.memory_space<vmem>>, vector<1x4x4xf32>
      tpu.vector_store %arg3[%c0_17, %c0_18, %c0_19], %20 {strides = array<i32>} : memref<1x4x4xf32, #tpu.memory_space<vmem>>, vector<1x4x4xf32>,
      %cst_20 = arith.constant 0.000000e+00 : f32
      %22 = vector.broadcast %cst_20 : f32 to vector<1x4x1xf32>
      %c0_21 = arith.constant 0 : index
      %c0_22 = arith.constant 0 : index
      %c0_23 = arith.constant 0 : index
      %23 = vector.load %arg4[%c0_21, %c0_22, %c0_23] : memref<1x4x1xf32, #tpu.memory_space<vmem>>, vector<1x4x1xf32>
      tpu.vector_store %arg4[%c0_21, %c0_22, %c0_23], %22 {strides = array<i32>} : memref<1x4x1xf32, #tpu.memory_space<vmem>>, vector<1x4x1xf32>,
    } else {
    }
    %c0 = arith.constant 0 : index
    %c0_1 = arith.constant 0 : index
    %c0_2 = arith.constant 0 : index
    %3 = vector.load %arg2[%c0, %c0_1, %c0_2] : memref<1x4x256xf32, #tpu.memory_space<vmem>>, vector<1x4x256xf32>
    %4 = vector.shape_cast %3 : vector<1x4x256xf32> to vector<4x256xf32>
    %c0_3 = arith.constant 0 : index
    %c0_4 = arith.constant 0 : index
    %c0_5 = arith.constant 0 : index
    %5 = vector.load %arg3[%c0_3, %c0_4, %c0_5] : memref<1x4x4xf32, #tpu.memory_space<vmem>>, vector<1x4x4xf32>
    %6 = vector.shape_cast %5 : vector<1x4x4xf32> to vector<4x4xf32>
    %cst = arith.constant dense<0.000000e+00> : vector<4x4xf32>
    %7 = tpu.matmul %4, %4, %cst {dimension_numbers = #tpu.dot_dimension_numbers<[1], [1], [0], [0], [0, 0, 1, 0], [], []>} : vector<4x256xf32>, vector<4x256xf32>, vector<4x4xf32> -> vector<4x4xf32>
    %8 = arith.addf %6, %7 : vector<4x4xf32>
    %c0_6 = arith.constant 0 : index
    %c0_7 = arith.constant 0 : index
    %c0_8 = arith.constant 0 : index
    %9 = vector.load %arg3[%c0_6, %c0_7, %c0_8] : memref<1x4x4xf32, #tpu.memory_space<vmem>>, vector<1x4x4xf32>
    %10 = vector.shape_cast %9 : vector<1x4x4xf32> to vector<4x4xf32>
    %11 = vector.shape_cast %8 : vector<4x4xf32> to vector<1x4x4xf32>
    tpu.vector_store %arg3[%c0_6, %c0_7, %c0_8], %11 {strides = array<i32>} : memref<1x4x4xf32, #tpu.memory_space<vmem>>, vector<1x4x4xf32>,
    %c0_9 = arith.constant 0 : index
    %c0_10 = arith.constant 0 : index
    %c0_11 = arith.constant 0 : index
    %12 = vector.load %arg4[%c0_9, %c0_10, %c0_11] : memref<1x4x1xf32, #tpu.memory_space<vmem>>, vector<1x4x1xf32>
    %13 = vector.shape_cast %12 : vector<1x4x1xf32> to vector<4x1xf32>
    %cst_12 = arith.constant dense<0.000000e+00> : vector<4xf32>
    %14 = vector.multi_reduction <add>, %4, %cst_12 [1] : vector<4x256xf32> to vector<4xf32>
    %15 = vector.shape_cast %14 : vector<4xf32> to vector<4x1xf32>
    %16 = arith.addf %13, %15 : vector<4x1xf32>
    %c0_13 = arith.constant 0 : index
    %c0_14 = arith.constant 0 : index
    %c0_15 = arith.constant 0 : index
    %17 = vector.load %arg4[%c0_13, %c0_14, %c0_15] : memref<1x4x1xf32, #tpu.memory_space<vmem>>, vector<1x4x1xf32>
    %18 = vector.shape_cast %17 : vector<1x4x1xf32> to vector<4x1xf32>
    %19 = vector.shape_cast %16 : vector<4x1xf32> to vector<1x4x1xf32>
    tpu.vector_store %arg4[%c0_13, %c0_14, %c0_15], %19 {strides = array<i32>} : memref<1x4x1xf32, #tpu.memory_space<vmem>>, vector<1x4x1xf32>,
    return
  }
  func.func @transform_0(%arg0: i32, %arg1: i32) -> (i32, i32, i32) {
    %c0_i32 = arith.constant 0 : i32
    %c0_i32_0 = arith.constant 0 : i32
    return %arg0, %c0_i32, %arg1 : i32, i32, i32
  }
  func.func @transform_1(%arg0: i32, %arg1: i32) -> (i32, i32, i32) {
    %c0_i32 = arith.constant 0 : i32
    %c0_i32_0 = arith.constant 0 : i32
    %c0_i32_1 = arith.constant 0 : i32
    return %arg0, %c0_i32, %c0_i32_0 : i32, i32, i32
  }
  func.func @transform_2(%arg0: i32, %arg1: i32) -> (i32, i32, i32) {
    %c0_i32 = arith.constant 0 : i32
    %c0_i32_0 = arith.constant 0 : i32
    %c0_i32_1 = arith.constant 0 : i32
    return %arg0, %c0_i32, %c0_i32_0 : i32, i32, i32
  }
}

</mosaic_0001>

<bundles_post_ra>
// kernel: tpu_custom_call.1
= control target key start
LH: loop header
LB: loop body
LE: loop exit
PB: predicated region body
PF: predicated region fallthrough
CT: control target
= control target key end

     0   :  { %8 = vsyncpa [#allocation3], 0  ;;  %s808_s0 = inlined_call_operand.hbm [shape: f32[2,4,256], index: 0, kind: input, shape index: {}]   ;;  %s809_s1 = inlined_call_operand.hbm [shape: f32[2,4,4], index: 1, kind: output, shape index: {0}]   ;;  %s810_s2 = inlined_call_operand.vmem [shape: f32[2,4,1], index: 2, kind: output, shape index: {1}]  }
   0x1   :  { %10 = vsyncpa [#allocation3 + $0x1], 0 }
   0x2   :  { %11 = vsyncpa [#allocation4], 0 }
   0x3   :  { %13 = vsyncpa [#allocation4 + $0x1], 0  ;;  %s622_s9 = smov 0   ;;  %s624_s10 = smov 0  }
   0x4   :  { %s626_s11 = smov 0   ;;  %s628_s12 = smov 0  }
   0x5   :  { %s630_s13 = smov 0   ;;  %s632_s14 = smov 0  }
   0x6 LB: > { %s410_s15 = sadd.s32 4294967295, %s602_s14   ;;  %s411_s16 = sadd.s32 4294967294, %s602_s14   ;;  %s602_s14 = sphi %s632_s14, %s19_s14   ;;  %s598_s13 = sphi %s630_s13, %s826_s13   ;;  %s594_s12 = sphi %s628_s12, %s825_s12   ;;  %s590_s11 = sphi %s626_s11, %s824_s11   ;;  %s586_s10 = sphi %s624_s10, %s823_s10   ;;  %s582_s9 = sphi %s622_s9, %s822_s9  }
   0x7   : > { %s31_s17 = sadd.s32 1, %s598_s13  ;;  %s40_s18 = sadd.s32 1, %s590_s11 }
   0x8   : > { %p33_p0 = scmp.ge.s32.totalorder %s31_s17, 2  ;;  %p47_p1 = scmp.ne.s32.totalorder %s590_s11, %s586_s10 }
   0x9   : > { %p48_p2 = scmp.eq.s32.totalorder %s602_s14, 0  ;;  %p53_p3 = scmp.ne.s32.totalorder %s586_s10, %s582_s9 }
   0xa   : > { %s828_s17 = smov (%p33_p0, %s31_s17), 0  ;;  %p54_p5 = scmp.eq.s32.totalorder %s410_s15, 0 }
   0xb   : > { %p663_p4 = por %p48_p2, %p47_p1  ;;  %s35_s20 = ssub.s32 %s598_s13, %s828_s17 }
   0xc   : > { %p77_p6 = scmp.eq.s32.totalorder %s410_s15, 1  ;;  %p38_p7 = scmp.eq.s32.totalorder %s35_s20, 0 }
   0xd   : > { %p669_p8 = por %p54_p5, %p53_p3  ;;  %p83_p10 = scmp.eq.s32.totalorder %s411_s16, 1 }
   0xe   : > { %p673_p9 = por %p77_p6, %p47_p1  ;;  %p438_p13 = scmp.lt.s32.totalorder %s602_s14, 2 }
   0xf   : > { %s678_s23 = scalar_select %p38_p7, %s590_s11, %s40_s18  }
  0x10   : > { %s814_s22 = scalar_select %p673_p9, 1, 0 }
  0x11   : > { %p680_p11 = por %p83_p10, %p53_p3  ;;  %s129_s25 = sand.u32 1, %s590_s11  }
  0x12   : > { %s414_s26 = sshll.u32 %s129_s25, 3  ;;  %s425_s27 = sshll.u32 %s598_s13, 7 }
  0x13   : > { %s815_s24 = scalar_select %p680_p11, 1, 0 }
  0x14   : > { %s691_s30 = scalar_lea.hbm %s808_s0, %s425_s27  ;;  %s133_s3 = scalar_lea.vmem [#allocation2], %s414_s26 }
  0x15   : > { %s143_s4 = sshll.u32 %s133_s3, 4  ;;  %p697_p0 = pnand %p438_p13, %p663_p4  ;;  %s693_s4 = int_to_ptr.vmem [resolvable:$true] %s143_s4 }
  0x16   : > { %s130_s6 = scalar_lea.sflag [#allocation3], %s129_s25  ;;  %s490_s7 = scalar_lea.hbm %s691_s30, 128 }
  0x17   : > { %p491_p3 = scmp.ne.s32.totalorder %s691_s30, %s490_s7  ;;  %p492_p5 = pneg %p697_p0 }
  0x18   : > { %s495_s16 = scalar_lea.hbm %s808_s0, 256  ;;  %p496_p4 = scmp.lt.u32.totalorder %s691_s30, %s808_s0 }
  0x19   : > { %p493_p6 = pnand %p492_p5, %p491_p3  ;;  %p497_p10 = scmp.lt.u32.totalorder %s495_s16, %s490_s7 }
  0x1a   : > { %p499_p12 = scmp.lt.u32.totalorder %s490_s7, %s691_s30 }
  0x1b   : > { %p494_p7 = pneg %p493_p6  ;;  %p498_p13 = por %p497_p10, %p496_p4 }
  0x1d   : > { %p500_p1 = por %p499_p12, %p498_p13 }
  0x1f   : > { %p501_p2 = pnand %p500_p1, %p494_p7 }
  0x21   : > { %504 = shalt.err (!%p501_p2)
}
  0x22   : > { %s505_s20 = scalar_lea.vmem %s693_s4, 128  ;;  %s604_s25 = smov [#allocation2]  }
  0x23   : > { %p506_p3 = scmp.ne.s32.totalorder %s693_s4, %s505_s20  ;;  %s510_s26 = sshll.u32 %s604_s25, 4  ;;  %s511_s26 = int_to_ptr.vmem [resolvable:$false] %s510_s26 }
  0x24   : > { %s512_s27 = scalar_lea.vmem %s511_s26, 256  ;;  %p513_p9 = scmp.lt.s32.totalorder %s693_s4, %s511_s26 }
  0x25   : > { %p508_p6 = pnand %p506_p3, %p492_p5  ;;  %p514_p4 = scmp.lt.s32.totalorder %s512_s27, %s505_s20 }
  0x27   : > { %p509_p11 = pneg %p508_p6  ;;  %p515_p10 = por %p514_p4, %p513_p9 }
  0x29   : > { %p516_p12 = pnand %p515_p10, %p509_p11 }
  0x2b   : > { %519 = shalt.err (!%p516_p12)
}
  0x2c   : > { %433 = dma.hbm_to_vmem [thread:$0]  (!%p697_p0), %s691_s30, 128, %s693_s4, %s130_s6  }
  0x2d   : > { %p817_p1 = scmp.lt.s32.totalorder %s602_s14, 3  ;;  %p818_p2 = scmp.ge.s32.totalorder %s602_s14, 1 }
  0x2f   : > { %p149_p5 = pnand %p818_p2, %p817_p1 }
  0x30   : > { %s733_s28 = sand.u32 (!%p149_p5), 1, %s586_s10  }
  0x31   : > { %152 = sbr.rel (%p149_p5) target bundleno = 292 (0x124), region = 24  ;;  %s418_s29 = sshll.u32 (!%p149_p5), %s733_s28, 3 }
  0x32   : > { %s155_s3 = scalar_lea.sflag (!%p149_p5), [#allocation3], %s733_s28  ;;  %s158_s7 = scalar_lea.vmem (!%p149_p5), [#allocation2], %s418_s29 }
  0x38   : > { %573 = dma.done.wait (%p669_p8), %s155_s3, 128  }
  0x39   : > { %575 = vsyncadd (%p669_p8), %s155_s3, 4294967168  ;;  %s419_s30 = sshll.u32 %s733_s28, 2  ;;  %vm192_vm0 = vcmask 27648   ;;  %v605_v0 = vmov 0.0   ;;  %vm275_vm1 = vcmask 1043456   ;;  %v196_v1 = vld [vmem:[%s158_s7] sm:$0xff] }
  0x3a   : > { %s742_s4 = scalar_lea.vmem [#allocation5], %s419_s30  ;;  %v199_v2 = vcombine.high %v196_v1, %v196_v1  ;;  %v276_v3 = vsel %vm275_vm1, %v196_v1, 0.0  ;;  %p184_p8 = scmp.lt.s32.totalorder %s594_s12, 1  ;;  %vm194_vm2 = vcmask 3072  }
  0x3b   : > { %193 = vst.msk [vmem:[%s742_s4] sm:$0xf] %vm192_vm0, %v605_v0  ;;  %s422_s16 = sshll.u32 %s594_s12, 6  ;;  %s302_s18 = sshll.u32 %s742_s4, 4  ;;  %s759_s18 = int_to_ptr.vmem [resolvable:$true] %s302_s18 }
  0x3c   : > { %201 = vmatprep.subr.mxu0 %v199_v2  ;;  %265 = vmatprep.mubr.f32.mxu0 %v199_v2  ;;  %v277_v4 = vsel %vm275_vm1, %v199_v2, 0.0  ;;  %s185_s21 = scalar_select %p184_p8, %s594_s12, 1 }
  0x3d   : > { %202 = vmatpush1.xpose.msra.mxu0 %v196_v1  ;;  %v278_v5 = vadd.f32 %v277_v4, %v276_v3  ;;  %s757_s25 = scalar_lea.hbm %s809_s1, %s422_s16  ;;  %s285_s26 = scalar_lea.sflag [#allocation4], %s733_s28 }
  0x3e   : > { %s420_s5 = sshll.u32 %s185_s21, 2  ;;  %s520_s27 = scalar_lea.vmem %s759_s18, 64 }
  0x3f   : > { %279 = vadd.xlane.f32.xlu0 %v278_v5  ;;  %s187_s15 = scalar_lea.vmem %s810_s2, %s420_s5  ;;  %p521_p9 = scmp.ne.s32.totalorder %s759_s18, %s520_s27 }
  0x40   : > { %266 = vmatmul.mubr.f32.vlgmr.msra.gmra.mrb[0].mxu0 %v196_v1  ;;  %195 = vst.msk [vmem:[%s187_s15] sm:$0xf] %vm194_vm2, %v605_v0  ;;  %p819_p11 = scmp.ne.s32.totalorder %s814_s22, 0  ;;  %s606_s12 = smov [#allocation5]  }
  0x41   : > { %s524_s29 = sshll.u32 %s606_s12, 4  ;;  %s525_s29 = int_to_ptr.vmem [resolvable:$false] %s524_s29 }
  0x42   : > { %v197_v9 = vld [vmem:[%s742_s4] sm:$0xf]  ;;  %p522_p0 = pnand %p521_p9, %p819_p11  ;;  %s526_s3 = scalar_lea.vmem %s525_s29, 128 }
  0x43   : > { %p527_p13 = scmp.lt.s32.totalorder %s759_s18, %s525_s29  ;;  %p528_p3 = scmp.lt.s32.totalorder %s526_s3, %s520_s27 }
  0x44   : > { %p523_p7 = pneg %p522_p0 }
  0x45   : > { %p529_p6 = por %p528_p3, %p527_p13 }
  0x47   : > { %v274_v6 = vld [vmem:[%s187_s15] sm:$0xf]  ;;  %p530_p4 = pnand %p529_p6, %p523_p7 }
  0xcc   : > { %v280_v7 = vpop.xlane.xlu0 %279 }
  0xcd   : > { %v281_v8 = vadd.f32 %v280_v7, %v274_v6 }
  0xcf   : > { %283 = vst.msk [vmem:[%s187_s15] sm:$0xf] %vm194_vm2, %v281_v8 }
 0x113   : > { %v267_v10 = vpop.f32.mrb[0].mxu0 }
 0x114   : > { %v271_v11 = vadd.f32 %v267_v10, %v197_v9  ;;  %v269_v12 = vpop.f32.mrb[1].mxu0 }
 0x116   : > { %273 = vst.msk [vmem:[%s742_s4] sm:$0xf] %vm192_vm0, %v271_v11 }
 0x117   : > { %533 = shalt.err (!%p530_p4)
}
 0x118   : > { %s534_s28 = scalar_lea.hbm %s757_s25, 64  ;;  %s538_s4 = scalar_lea.hbm %s809_s1, 128 }
 0x119   : > { %p535_p10 = scmp.ne.s32.totalorder %s757_s25, %s534_s28  ;;  %p539_p2 = scmp.lt.u32.totalorder %s757_s25, %s809_s1 }
 0x11a   : > { %p540_p5 = scmp.lt.u32.totalorder %s538_s4, %s534_s28  ;;  %p542_p9 = scmp.lt.u32.totalorder %s534_s28, %s757_s25 }
 0x11b   : > { %p536_p12 = pnand %p535_p10, %p819_p11 }
 0x11c   : > { %p541_p8 = por %p540_p5, %p539_p2 }
 0x11d   : > { %p537_p1 = pneg %p536_p12 }
 0x11e   : > { %p543_p0 = por %p542_p9, %p541_p8 }
 0x120   : > { %p544_p7 = pnand %p543_p0, %p537_p1 }
 0x122   : > { %547 = shalt.err (!%p544_p7)
}
 0x123   : > { %428 = dma.vmem_to_hbm [thread:$0]  (%p819_p11), %s759_s18, 64, %s757_s25, %s285_s26  }
 0x124 PF: > { %s317_s6 = sand.u32 1, %s582_s9   ;;  %p820_p13 = scmp.ne.s32.totalorder %s815_s24, 0 }
 0x125   : > { %p821_p3 = scmp.ge.s32.totalorder %s602_s14, 2  ;;  %s318_s8 = scalar_lea.sflag [#allocation4], %s317_s6 }
 0x127   : > { %p435_p6 = pnand %p821_p3, %p820_p13 }
 0x129   : > { %577 = dma.done.wait (!%p435_p6), %s318_s8, 64  }
 0x12a   : > { %579 = vsyncadd (!%p435_p6), %s318_s8, 4294967232  ;;  %s19_s14 = sadd.s32 1, %s602_s14   ;;  %s822_s9 = smov %s586_s10 }
 0x12b   : > { %p16_p4 = scmp.ge.s32.totalorder %s19_s14, 4   ;;  %s823_s10 = smov %s590_s11 }
 0x12c   : > { %s824_s11 = smov %s678_s23  ;;  %s825_s12 = smov %s598_s13 }
 0x12d   : > { %s826_s13 = smov %s828_s17  ;;  %18 = sbr.rel (!%p16_p4) target bundleno = 6 (0x6), region = 85 }
 0x134   :  { %330 = vsyncpa [#allocation3], 1 }
 0x135   :  { %332 = vsyncpa [#allocation3 + $0x1], 1 }
 0x136   :  { %333 = vsyncpa [#allocation4], 1 }
 0x137   :  { %335 = vsyncpa [#allocation4 + $0x1], 1 }

</bundles_post_ra>
